<compile_context>
chip_gen: v7x
topology: tpu7x:2x2x1
jax: 0.10.0
libtpu: 0.0.40
codegen_flags: <defaults>
</compile_context>

<pallas_src>
import functools

import jax
import jax.numpy as jnp
from jax.experimental import pallas as pl
from jax.experimental.pallas import tpu as pltpu

THRESHOLD = 0.5
LANE = 128
SUBLANE = 8


def _cm_kernel(p_ref, t_ref, o_ref):
    """Accumulate vreg-shaped partial sums of p*t, p, t over the row tiles.

    o_ref is a (3, 8, 128) f32 block resident in VMEM across the whole grid
    (its index_map is constant), so it doubles as the accumulator.
    """
    i = pl.program_id(0)

    @pl.when(i == 0)
    def _():
        o_ref[...] = jnp.zeros_like(o_ref)

    # Threshold / cast inside the kernel (VPU work hidden under the DMA).
    p = (p_ref[...] > THRESHOLD).astype(jnp.float32)
    t = t_ref[...].astype(jnp.float32)

    # Fold the (tile_rows, 128) tile onto the (8, 128) accumulators.  The
    # reshape is sublane-tile aligned (no relayout) and the axis-0 sums lower
    # to plain VPU adds -- no per-step cross-lane XLU work.
    k = p.shape[0] // SUBLANE
    p3 = p.reshape(k, SUBLANE, LANE)
    t3 = t.reshape(k, SUBLANE, LANE)
    o_ref[0, :, :] = o_ref[0, :, :] + jnp.sum(p3 * t3, axis=0)
    o_ref[1, :, :] = o_ref[1, :, :] + jnp.sum(p3, axis=0)
    o_ref[2, :, :] = o_ref[2, :, :] + jnp.sum(t3, axis=0)


def _sublane_granularity(dtype):
    # f32 -> 8 rows, bf16/f16 -> 16, int8/bool/fp8 -> 32 (packed sublanes).
    return SUBLANE * max(1, 4 // jnp.dtype(dtype).itemsize)


@functools.partial(jax.jit, static_argnames=("tile_rows",))
def confusion_matrix(y_pred, y_true, *, tile_rows=4096):
    """Pallas implementation of ConfusionMatrix().forward(y_pred, y_true).

    y_pred, y_true: arrays of identical shape (any rank, any float/int dtype);
    flattened like torch's view(-1).  Returns a (2, 2) int32 matrix
    [[TP, FP], [FN, TN]].
    """
    assert y_pred.shape == y_true.shape

    p = y_pred.reshape(-1)
    t = y_true.reshape(-1)
    n = p.shape[0]

    gran = max(_sublane_granularity(y_pred.dtype),
               _sublane_granularity(y_true.dtype))

    # Lane alignment.  For n % 128 == 0 (any realistic segmentation shape)
    # this branch is skipped and the reshape below is a free bitcast -- no
    # extra HBM pass.  Zero padding here is neutral for sum(p*t)/sum(p)/sum(t)
    # and TN is reconstructed from the true n.
    if n % LANE != 0:
        # TODO(synk): rare unaligned-n path still costs one pad copy.
        pad = LANE - (n % LANE)
        p = jnp.pad(p, (0, pad))
        t = jnp.pad(t, (0, pad))
    rows = p.shape[0] // LANE
    p2 = p.reshape(rows, LANE)
    t2 = t.reshape(rows, LANE)

    # Tile selection: largest multiple of the sublane granularity that is
    # <= tile_rows and <= rows.  4096 f32 rows = 2 MiB per input buffer
    # (8 MiB total double-buffered) -> fits v5e's 16 MiB scoped-VMEM default.
    tr = max(gran, (min(tile_rows, rows) // gran) * gran)
    nblk = rows // tr          # kernel covers only full tiles (no masking)
    bulk_rows = nblk * tr

    inter = jnp.int32(0)       # sum(p * t)
    psum = jnp.int32(0)        # sum(p)
    tsum = jnp.int32(0)        # sum(t)

    if nblk > 0:
        itemsize = p.dtype.itemsize + t.dtype.itemsize
        partials = pl.pallas_call(
            _cm_kernel,
            out_shape=jax.ShapeDtypeStruct((3, SUBLANE, LANE), jnp.float32),
            grid_spec=pltpu.PrefetchScalarGridSpec(
                num_scalar_prefetch=0,
                grid=(nblk,),
                in_specs=[
                    pl.BlockSpec((tr, LANE), lambda i: (i, 0)),
                    pl.BlockSpec((tr, LANE), lambda i: (i, 0)),
                ],
                out_specs=pl.BlockSpec((3, SUBLANE, LANE),
                                       lambda i: (0, 0, 0)),
            ),
            compiler_params=pltpu.CompilerParams(
                dimension_semantics=("arbitrary",),
            ),
            cost_estimate=pl.CostEstimate(
                flops=6 * bulk_rows * LANE,
                transcendentals=0,
                bytes_accessed=bulk_rows * LANE * itemsize
                + 3 * SUBLANE * LANE * 4,
            ),
        )(p2, t2)
        # Each partial cell is an exact small integer in f32; cast to int32
        # before reducing so the totals stay exact up to 2^31 elements.
        s = jnp.sum(partials.astype(jnp.int32), axis=(1, 2))
        inter, psum, tsum = s[0], s[1], s[2]

    # Sub-tile tail (< tr rows): tiny, reduced directly in the wrapper.  This
    # is what lets the kernel avoid both padding and per-step masking.
    if bulk_rows < rows:
        pt = (p2[bulk_rows:] > THRESHOLD).astype(jnp.int32)
        tt = t2[bulk_rows:].astype(jnp.int32)
        inter = inter + jnp.sum(pt * tt)
        psum = psum + jnp.sum(pt)
        tsum = tsum + jnp.sum(tt)

    tp = inter
    fp = psum - inter
    fn = tsum - inter
    tn = jnp.int32(n) - psum - tsum + inter   # true n: padding never leaks in
    cm = jnp.stack([jnp.stack([tp, fp]), jnp.stack([fn, tn])])
    # TODO(synk): torch returns int64; JAX default (x64 off) only has int32.
    return cm


def confusion_matrix_ref(y_pred, y_true):
    """Pure-JAX reference matching the PyTorch module."""
    p = (y_pred.reshape(-1) > THRESHOLD).astype(jnp.float32)
    t = y_true.reshape(-1).astype(jnp.float32)
    tp = jnp.sum(p * t)
    fp = jnp.sum(p * (1.0 - t))
    fn = jnp.sum((1.0 - p) * t)
    tn = jnp.sum((1.0 - p) * (1.0 - t))
    return jnp.stack([jnp.stack([tp, fp]),
                      jnp.stack([fn, tn])]).astype(jnp.int32)


if __name__ == "__main__":
    key = jax.random.PRNGKey(0)
    k1, k2 = jax.random.split(key)

    # Small shapes consistent with a segmentation output: [B, C, H, W].
    B, C, H, W = 2, 4, 16, 16
    y_pred = jax.nn.sigmoid(jax.random.normal(k1, (B, C, H, W), jnp.float32))
    y_true = (jax.random.uniform(k2, (B, C, H, W)) > 0.5).astype(jnp.float32)

    cm = confusion_matrix(y_pred, y_true)
    jax.block_until_ready(cm)

    ref = confusion_matrix_ref(y_pred, y_true)
    assert cm.shape == (2, 2) and cm.dtype == jnp.int32, (cm.shape, cm.dtype)
    assert jnp.array_equal(cm, ref), (cm, ref)
    assert int(cm.sum()) == B * C * H * W, cm

    # Low-precision streaming path (bf16 inputs, no wrapper upcast): halves
    # HBM traffic for the same result.
    cm_bf16 = confusion_matrix(y_pred.astype(jnp.bfloat16),
                               y_true.astype(jnp.bfloat16))
    jax.block_until_ready(cm_bf16)
    ref_bf16 = confusion_matrix_ref(y_pred.astype(jnp.bfloat16),
                                    y_true.astype(jnp.bfloat16))
    assert jnp.array_equal(cm_bf16, ref_bf16), (cm_bf16, ref_bf16)

    print("KERNEL_OK")
</pallas_src>

<mosaic_0001>
module attributes {stable_mosaic.version = 11 : i64} {
  func.func @_cm_kernel(%arg0: i32, %arg1: memref<16x128xf32, #tpu.memory_space<vmem>>, %arg2: memref<16x128xf32, #tpu.memory_space<vmem>>, %arg3: memref<3x8x128xf32, #tpu.memory_space<vmem>>) attributes {dimension_semantics = [#tpu.dimension_semantics<arbitrary>], iteration_bounds = array<i64: 1>, scalar_prefetch = 0 : i64, scratch_operands = 0 : i64, tpu.core_type = #tpu.core_type<tc>, window_params = [{transform_indices = @transform_0, window_bounds = array<i64: 16, 128>}, {transform_indices = @transform_1, window_bounds = array<i64: 16, 128>}, {pipeline_mode = #tpu.pipeline_mode<synchronous>, transform_indices = @transform_2, window_bounds = array<i64: 3, 8, 128>}]} {
    %c0_i32 = arith.constant 0 : i32
    %0 = arith.cmpi eq, %arg0, %c0_i32 : i32
    %1 = arith.extui %0 : i1 to i32
    %c0_i32_0 = arith.constant 0 : i32
    %2 = arith.cmpi ne, %1, %c0_i32_0 : i32
    scf.if %2 {
      %cst_23 = arith.constant 0.000000e+00 : f32
      %33 = vector.broadcast %cst_23 : f32 to vector<3x8x128xf32>
      %c0_24 = arith.constant 0 : index
      %c0_25 = arith.constant 0 : index
      %c0_26 = arith.constant 0 : index
      %34 = vector.load %arg3[%c0_24, %c0_25, %c0_26] : memref<3x8x128xf32, #tpu.memory_space<vmem>>, vector<3x8x128xf32>
      tpu.vector_store %arg3[%c0_24, %c0_25, %c0_26], %33 {strides = array<i32>} : memref<3x8x128xf32, #tpu.memory_space<vmem>>, vector<3x8x128xf32>,
    } else {
    }
    %c0 = arith.constant 0 : index
    %c0_1 = arith.constant 0 : index
    %3 = vector.load %arg1[%c0, %c0_1] : memref<16x128xf32, #tpu.memory_space<vmem>>, vector<16x128xf32>
    %cst = arith.constant 5.000000e-01 : f32
    %4 = vector.broadcast %cst : f32 to vector<16x128xf32>
    %5 = arith.cmpf ogt, %3, %4 : vector<16x128xf32>
    %6 = arith.extui %5 : vector<16x128xi1> to vector<16x128xi32>
    %7 = arith.sitofp %6 : vector<16x128xi32> to vector<16x128xf32>
    %c0_2 = arith.constant 0 : index
    %c0_3 = arith.constant 0 : index
    %8 = vector.load %arg2[%c0_2, %c0_3] : memref<16x128xf32, #tpu.memory_space<vmem>>, vector<16x128xf32>
    %9 = vector.shape_cast %7 : vector<16x128xf32> to vector<2x8x128xf32>
    %10 = vector.shape_cast %8 : vector<16x128xf32> to vector<2x8x128xf32>
    %c0_4 = arith.constant 0 : index
    %c0_5 = arith.constant 0 : index
    %c0_6 = arith.constant 0 : index
    %11 = vector.load %arg3[%c0_4, %c0_5, %c0_6] : memref<3x8x128xf32, #tpu.memory_space<vmem>>, vector<1x8x128xf32>
    %12 = vector.shape_cast %11 : vector<1x8x128xf32> to vector<8x128xf32>
    %13 = arith.mulf %9, %10 : vector<2x8x128xf32>
    %cst_7 = arith.constant dense<0.000000e+00> : vector<8x128xf32>
    %14 = vector.multi_reduction <add>, %13, %cst_7 [0] : vector<2x8x128xf32> to vector<8x128xf32>
    %15 = arith.addf %12, %14 : vector<8x128xf32>
    %c0_8 = arith.constant 0 : index
    %c0_9 = arith.constant 0 : index
    %c0_10 = arith.constant 0 : index
    %16 = vector.load %arg3[%c0_8, %c0_9, %c0_10] : memref<3x8x128xf32, #tpu.memory_space<vmem>>, vector<1x8x128xf32>
    %17 = vector.shape_cast %16 : vector<1x8x128xf32> to vector<8x128xf32>
    %18 = vector.shape_cast %15 : vector<8x128xf32> to vector<1x8x128xf32>
    tpu.vector_store %arg3[%c0_8, %c0_9, %c0_10], %18 {strides = array<i32>} : memref<3x8x128xf32, #tpu.memory_space<vmem>>, vector<1x8x128xf32>,
    %c1 = arith.constant 1 : index
    %c0_11 = arith.constant 0 : index
    %c0_12 = arith.constant 0 : index
    %19 = vector.load %arg3[%c1, %c0_11, %c0_12] : memref<3x8x128xf32, #tpu.memory_space<vmem>>, vector<1x8x128xf32>
    %20 = vector.shape_cast %19 : vector<1x8x128xf32> to vector<8x128xf32>
    %cst_13 = arith.constant dense<0.000000e+00> : vector<8x128xf32>
    %21 = vector.multi_reduction <add>, %9, %cst_13 [0] : vector<2x8x128xf32> to vector<8x128xf32>
    %22 = arith.addf %20, %21 : vector<8x128xf32>
    %c1_14 = arith.constant 1 : index
    %c0_15 = arith.constant 0 : index
    %c0_16 = arith.constant 0 : index
    %23 = vector.load %arg3[%c1_14, %c0_15, %c0_16] : memref<3x8x128xf32, #tpu.memory_space<vmem>>, vector<1x8x128xf32>
    %24 = vector.shape_cast %23 : vector<1x8x128xf32> to vector<8x128xf32>
    %25 = vector.shape_cast %22 : vector<8x128xf32> to vector<1x8x128xf32>
    tpu.vector_store %arg3[%c1_14, %c0_15, %c0_16], %25 {strides = array<i32>} : memref<3x8x128xf32, #tpu.memory_space<vmem>>, vector<1x8x128xf32>,
    %c2 = arith.constant 2 : index
    %c0_17 = arith.constant 0 : index
    %c0_18 = arith.constant 0 : index
    %26 = vector.load %arg3[%c2, %c0_17, %c0_18] : memref<3x8x128xf32, #tpu.memory_space<vmem>>, vector<1x8x128xf32>
    %27 = vector.shape_cast %26 : vector<1x8x128xf32> to vector<8x128xf32>
    %cst_19 = arith.constant dense<0.000000e+00> : vector<8x128xf32>
    %28 = vector.multi_reduction <add>, %10, %cst_19 [0] : vector<2x8x128xf32> to vector<8x128xf32>
    %29 = arith.addf %27, %28 : vector<8x128xf32>
    %c2_20 = arith.constant 2 : index
    %c0_21 = arith.constant 0 : index
    %c0_22 = arith.constant 0 : index
    %30 = vector.load %arg3[%c2_20, %c0_21, %c0_22] : memref<3x8x128xf32, #tpu.memory_space<vmem>>, vector<1x8x128xf32>
    %31 = vector.shape_cast %30 : vector<1x8x128xf32> to vector<8x128xf32>
    %32 = vector.shape_cast %29 : vector<8x128xf32> to vector<1x8x128xf32>
    tpu.vector_store %arg3[%c2_20, %c0_21, %c0_22], %32 {strides = array<i32>} : memref<3x8x128xf32, #tpu.memory_space<vmem>>, vector<1x8x128xf32>,
    return
  }
  func.func @transform_0(%arg0: i32) -> (i32, i32) {
    %c0_i32 = arith.constant 0 : i32
    %c0_i32_0 = arith.constant 0 : i32
    return %arg0, %c0_i32 : i32, i32
  }
  func.func @transform_1(%arg0: i32) -> (i32, i32) {
    %c0_i32 = arith.constant 0 : i32
    %c0_i32_0 = arith.constant 0 : i32
    return %arg0, %c0_i32 : i32, i32
  }
  func.func @transform_2(%arg0: i32) -> (i32, i32, i32) {
    %c0_i32 = arith.constant 0 : i32
    %c0_i32_0 = arith.constant 0 : i32
    %c0_i32_1 = arith.constant 0 : i32
    %c0_i32_2 = arith.constant 0 : i32
    return %c0_i32, %c0_i32_0, %c0_i32_1 : i32, i32, i32
  }
}

</mosaic_0001>

<bundles_post_ra>
// kernel: confusion_matrix.1
= control target key start
LH: loop header
LB: loop body
LE: loop exit
PB: predicated region body
PF: predicated region fallthrough
CT: control target
= control target key end

     0   :  { %v55_v4 = vmov 0.0   ;;  %s92_s0 = inlined_call_operand.vmem [shape: f32[16,128], index: 0, kind: input, shape index: {}]   ;;  %s93_s1 = inlined_call_operand.vmem [shape: f32[16,128], index: 1, kind: input, shape index: {}]   ;;  %s94_s2 = inlined_call_operand.vmem [shape: f32[3,8,128], index: 2, kind: output, shape index: {}]  }
   0x1   :  { %v18_v0 = vld [vmem:[%s92_s0] sm:$0xff]  ;;  %v19_v1 = vld [vmem:[%s92_s0 + $0x8] sm:$0xff] }
   0x2   :  { %v26_v2 = vld [vmem:[%s93_s1] sm:$0xff]  ;;  %vm20_vm0 = vcmp.gt.f32.partialorder %v18_v0, 0.5  ;;  %vm21_vm1 = vcmp.gt.f32.partialorder %v19_v1, 0.5  ;;  %v27_v3 = vld [vmem:[%s93_s1 + $0x8] sm:$0xff] }
   0x3   :  { %v48_v5 = vsel %vm20_vm0, 1.0, %v55_v4  ;;  %v49_v6 = vsel %vm21_vm1, 1.0, %v55_v4  ;;  %v41_v7 = vadd.f32 %v27_v3, %v26_v2 }
   0x4   :  { %v29_v8 = vmul.f32 %v48_v5, %v26_v2  ;;  %v30_v9 = vmul.f32 %v49_v6, %v27_v3  ;;  %v36_v10 = vadd.f32 %v49_v6, %v48_v5 }
   0x5   :  { %53 = vst [vmem:[%s94_s2 + $0x10] sm:$0xff] %v41_v7 }
   0x6   :  { %v31_v11 = vadd.f32 %v30_v9, %v29_v8  ;;  %51 = vst [vmem:[%s94_s2 + $0x8] sm:$0xff] %v36_v10 }
   0x8   :  { %33 = vst [vmem:[%s94_s2] sm:$0xff] %v31_v11 }

</bundles_post_ra>
